<compile_context>
chip_gen: v6e
topology: v6e:2x2x1
jax: 0.10.0
libtpu: 0.0.40
codegen_flags: <defaults>
</compile_context>

<pallas_src>
import functools
import numpy as np

import jax
import jax.numpy as jnp
from jax import lax
from jax.experimental import pallas as pl
from jax.experimental.pallas import tpu as pltpu

TARGET_PAIR_DICT = {0: None, 1: 8, 2: None, 3: None, 4: 9, 5: 10, 6: 11, 7: 12,
                    8: 1, 9: 4, 10: 5, 11: 6, 12: 7}


# ----------------------------- setup glue (plain numpy) ----------------------------- #
def get_soft_matrix(class_num, smooth_type, smooth_ratio, smooth_pair):
    """Reproduces SmoothingCELoss.get_soft_matrix."""
    sm = np.eye(class_num, dtype=np.float32)
    if smooth_type == "normal":
        sm = sm * (1.0 - smooth_ratio) + smooth_ratio / class_num
        return sm
    elif smooth_type == "weighted":
        for c, c_p in TARGET_PAIR_DICT.items():
            row = sm[c].copy()
            if c_p is not None:
                row[c_p] = smooth_pair
            row = np.where(row == 0.0, smooth_ratio / class_num, row)
            row[c] = 1.0 - np.sum(row[row != 1.0])
            sm[c] = row
        return sm
    else:
        return None  # hard-label path (see TODO above)


# ----------------------------------- Pallas kernel ----------------------------------- #
def _smoothing_ce_kernel(softT_ref, logits_ref, labels_ref, loss_ref, cnt_ref,
                         loss_acc, cnt_acc, *, n_cols, tile_n, tiles_per_part):
    p = pl.program_id(0)          # partition ("parallel"; one TensorCore on v7x)
    i = pl.program_id(1)          # tile index within the partition (reduction axis)

    @pl.when(i == 0)
    def _():
        loss_acc[...] = jnp.zeros_like(loss_acc)
        cnt_acc[...] = jnp.zeros_like(cnt_acc)

    x = logits_ref[...].astype(jnp.float32)        # (C, TN) -- samples on the lane axis
    labels = labels_ref[...]                       # (1, TN) int32
    c, tn = x.shape

    # Global sample (lane) ids of this tile.  Samples past the logical end (ragged tail, or the
    # clamped duplicate tile when p_parts*t_per_part > n_tiles) are masked with a select below, so
    # out-of-bounds garbage (even NaN/Inf, which is per-lane-confined here) never reaches the sums.
    block_idx = p * tiles_per_part + i             # UNclamped -- keep this invariant
    col = lax.broadcasted_iota(jnp.int32, (1, tn), 1)
    global_col = block_idx * tile_n + col
    valid = jnp.logical_and(global_col < n_cols, labels != -1)           # (1, TN)

    # Soft-target gather on the (otherwise idle) MXU:
    #   soft_w[c, s] = class_weight[c] * soft_matrix[labels[s], c]
    cls = lax.broadcasted_iota(jnp.int32, (c, tn), 0)
    onehot = (cls == labels).astype(jnp.float32)                         # (C, TN)
    soft_w = jnp.dot(softT_ref[...], onehot,
                     preferred_element_type=jnp.float32)                 # (C, TN)

    # Numerically stable log-sum-exp per sample; lane-dense (class reductions are tiny
    # sublane reduces, exp/log run on the EUP at full lane occupancy).
    m = jnp.max(x, axis=0, keepdims=True)                                # (1, TN)
    lse = jnp.log(jnp.sum(jnp.exp(x - m), axis=0, keepdims=True)) + m    # (1, TN)

    per_sample = jnp.sum(soft_w * (lse - x), axis=0, keepdims=True)      # (1, TN)
    per_sample = jnp.where(valid, per_sample, 0.0)

    loss_acc[...] += per_sample
    cnt_acc[...] += valid.astype(jnp.float32)

    # One cross-lane reduce + 1-lane store per partition (not per tile).
    @pl.when(i == tiles_per_part - 1)
    def _():
        loss_ref[...] = jnp.sum(loss_acc[...], axis=1, keepdims=True).reshape(1, 1, 1)
        cnt_ref[...] = jnp.sum(cnt_acc[...], axis=1, keepdims=True).reshape(1, 1, 1)


def _pick_parts(n_tiles):
    """2-way 'parallel' split only where it pays off (two TensorCores: v7x) and only when each
    partition still gets >= 2 tiles; on v5e/v6e it would just add wasted duplicate tiles."""
    if n_tiles < 4:
        return 1
    try:
        kind = jax.devices()[0].device_kind.lower()
    except Exception:
        return 1
    return 2 if "7" in kind else 1


def smoothing_ce_loss(y_pred, y_true, soft_matrix, class_weight=None, *,
                      tile_n=8192, parts=None):
    """y_pred: (..., C) float (any float dtype); y_true: (...) int with -1 = ignore.
    Returns the scalar mean loss (NaN when every label is ignored, matching PyTorch)."""
    c = y_pred.shape[-1]
    # Lane-dense layout: classes on sublanes, samples on lanes.  Keep the native dtype
    # (no forced f32 cast in the wrapper); the upcast happens in-kernel.
    logits_t = y_pred.reshape(-1, c).T                     # (C, N)
    labels = y_true.reshape(1, -1).astype(jnp.int32)       # (1, N)
    n = logits_t.shape[1]

    soft = jnp.asarray(soft_matrix, dtype=jnp.float32)
    if class_weight is not None:
        w = jnp.asarray(class_weight, dtype=jnp.float32).reshape(1, c)
        soft = soft * w                                    # fold class weights into the soft matrix
    soft_t = soft.T                                        # (C, C): soft_t[c, k] = w[c]*soft[k, c]

    # Tile over samples on the lane axis: full extent when N is small (no 128 constraint),
    # otherwise a multiple of 128.  VMEM per logits buffer is ~64*tile bytes (C=13 padded to 16
    # sublanes, f32), so even tile=8192 is ~0.5 MiB -- far below every chip's scoped VMEM limit.
    if n <= tile_n:
        tile = n
    else:
        tile = max(128, (tile_n // 128) * 128)
    n_tiles = pl.cdiv(n, tile)

    p_parts = _pick_parts(n_tiles) if parts is None else max(1, min(int(parts), n_tiles))
    t_per_part = pl.cdiv(n_tiles, p_parts)
    last_blk = n_tiles - 1

    def data_map(p, i):
        # Clamp so no block is entirely out of bounds; duplicate blocks are masked in-kernel
        # using the UNclamped block index.
        return (0, jnp.minimum(p * t_per_part + i, last_blk))

    kernel = functools.partial(_smoothing_ce_kernel, n_cols=n, tile_n=tile,
                               tiles_per_part=t_per_part)

    loss_p, cnt_p = pl.pallas_call(
        kernel,
        out_shape=(jax.ShapeDtypeStruct((p_parts, 1, 1), jnp.float32),
                   jax.ShapeDtypeStruct((p_parts, 1, 1), jnp.float32)),
        grid_spec=pltpu.PrefetchScalarGridSpec(
            num_scalar_prefetch=0,
            grid=(p_parts, t_per_part),
            in_specs=[
                pl.BlockSpec((c, c), lambda p, i: (0, 0)),      # weighted soft matrix^T (resident)
                pl.BlockSpec((c, tile), data_map),              # logits tile (C, tile)
                pl.BlockSpec((1, tile), data_map),              # labels tile (1, tile), lane-dense
            ],
            out_specs=[
                pl.BlockSpec((1, 1, 1), lambda p, i: (p, 0, 0)),  # loss partial per partition
                pl.BlockSpec((1, 1, 1), lambda p, i: (p, 0, 0)),  # valid-count partial
            ],
            scratch_shapes=[pltpu.VMEM((1, tile), jnp.float32),   # per-lane loss accumulator
                            pltpu.VMEM((1, tile), jnp.float32)],  # per-lane count accumulator
        ),
        compiler_params=pltpu.CompilerParams(
            dimension_semantics=("parallel", "arbitrary")),
    )(soft_t, logits_t, labels)

    # NOTE: like the PyTorch module, count == 0 (all labels ignored) yields NaN.
    return jnp.sum(loss_p) / jnp.sum(cnt_p)


# ----------------------------------- reference ----------------------------------- #
def reference_loss(y_pred, y_true, soft_matrix, class_weight=None):
    c = y_pred.shape[-1]
    logits = y_pred.reshape(-1, c).astype(jnp.float32)
    labels = y_true.reshape(-1)
    valid = labels != -1
    weight = (jnp.ones((c,), jnp.float32) if class_weight is None
              else jnp.asarray(class_weight, jnp.float32))
    soft = jnp.asarray(soft_matrix, jnp.float32)[jnp.clip(labels, 0)]
    logp = jax.nn.log_softmax(logits, axis=-1)
    per = -jnp.sum(soft * weight[None, :] * logp, axis=-1)
    per = jnp.where(valid, per, 0.0)
    return jnp.sum(per) / jnp.sum(valid.astype(jnp.float32))


# ----------------------------------- main ----------------------------------- #
if __name__ == "__main__":
    class_num = 13
    smooth_type = "weighted"      # remove_prefix=False keeps 'weighted'
    smooth_ratio = 0.1
    smooth_pair = 0.05
    soft_matrix = get_soft_matrix(class_num, smooth_type, smooth_ratio, smooth_pair)

    key = jax.random.PRNGKey(0)

    # ---- test 1: small (batch, seq) input -> single tile, single partition ----
    batch, seq = 2, 8
    k1, k2, k3, key = jax.random.split(key, 4)
    y_pred = jax.random.normal(k1, (batch, seq, class_num), dtype=jnp.float32)
    y_true = jax.random.randint(k2, (batch, seq), 0, class_num, dtype=jnp.int32)
    y_true = jnp.where(jax.random.bernoulli(k3, 0.25, (batch, seq)), -1, y_true)

    loss = jax.block_until_ready(smoothing_ce_loss(y_pred, y_true, soft_matrix))
    ref = jax.block_until_ready(reference_loss(y_pred, y_true, soft_matrix))
    np.testing.assert_allclose(np.asarray(loss), np.asarray(ref), rtol=1e-5, atol=1e-5)

    # ---- test 2: multi-tile ragged tail + class weights (N=210, tile=128 -> 2 tiles) ----
    batch2, seq2 = 3, 70
    k4, k5, k6, key = jax.random.split(key, 4)
    y_pred2 = jax.random.normal(k4, (batch2, seq2, class_num), dtype=jnp.float32)
    y_true2 = jax.random.randint(k5, (batch2, seq2), 0, class_num, dtype=jnp.int32)
    y_true2 = jnp.where(jax.random.bernoulli(k6, 0.2, (batch2, seq2)), -1, y_true2)
    class_weight = list(np.linspace(0.5, 1.5, class_num).astype(np.float32))

    loss2 = jax.block_until_ready(
        smoothing_ce_loss(y_pred2, y_true2, soft_matrix, class_weight, tile_n=128))
    ref2 = jax.block_until_ready(
        reference_loss(y_pred2, y_true2, soft_matrix, class_weight))
    np.testing.assert_allclose(np.asarray(loss2), np.asarray(ref2), rtol=1e-5, atol=1e-5)

    # ---- test 3: forced 2-partition grid with odd tile count (N=334, tile=128 -> 3 tiles,
    #      parts=2 -> one clamped duplicate tile) -> exercises the unclamped masking path ----
    batch3, seq3 = 2, 167
    k7, k8, k9, key = jax.random.split(key, 4)
    y_pred3 = jax.random.normal(k7, (batch3, seq3, class_num), dtype=jnp.float32)
    y_true3 = jax.random.randint(k8, (batch3, seq3), 0, class_num, dtype=jnp.int32)
    y_true3 = jnp.where(jax.random.bernoulli(k9, 0.15, (batch3, seq3)), -1, y_true3)

    loss3 = jax.block_until_ready(
        smoothing_ce_loss(y_pred3, y_true3, soft_matrix, tile_n=128, parts=2))
    ref3 = jax.block_until_ready(reference_loss(y_pred3, y_true3, soft_matrix))
    np.testing.assert_allclose(np.asarray(loss3), np.asarray(ref3), rtol=1e-5, atol=1e-5)

    print("KERNEL_OK")
</pallas_src>

<mosaic_0001>
module attributes {stable_mosaic.version = 11 : i64} {
  func.func @_smoothing_ce_kernel(%arg0: i32, %arg1: i32, %arg2: memref<13x13xf32, #tpu.memory_space<vmem>>, %arg3: memref<13x16xf32, #tpu.memory_space<vmem>>, %arg4: memref<1x16xi32, #tpu.memory_space<vmem>>, %arg5: memref<1x1x1xf32, #tpu.memory_space<vmem>>, %arg6: memref<1x1x1xf32, #tpu.memory_space<vmem>>, %arg7: memref<1x16xf32, #tpu.memory_space<vmem>>, %arg8: memref<1x16xf32, #tpu.memory_space<vmem>>) attributes {dimension_semantics = [#tpu.dimension_semantics<parallel>, #tpu.dimension_semantics<arbitrary>], iteration_bounds = array<i64: 1, 1>, scalar_prefetch = 0 : i64, scratch_operands = 2 : i64, tpu.core_type = #tpu.core_type<tc>, window_params = [{pipeline_mode = #tpu.pipeline_mode<synchronous>, transform_indices = @transform_0, window_bounds = array<i64: 13, 13>}, {transform_indices = @transform_1, window_bounds = array<i64: 13, 16>}, {transform_indices = @transform_2, window_bounds = array<i64: 1, 16>}, {transform_indices = @transform_3, window_bounds = array<i64: 1, 1, 1>}, {transform_indices = @transform_4, window_bounds = array<i64: 1, 1, 1>}]} {
    %c0_i32 = arith.constant 0 : i32
    %0 = arith.cmpi eq, %arg1, %c0_i32 : i32
    %1 = arith.extui %0 : i1 to i32
    %c0_i32_0 = arith.constant 0 : i32
    %2 = arith.cmpi ne, %1, %c0_i32_0 : i32
    scf.if %2 {
      %cst_21 = arith.constant 0.000000e+00 : f32
      %50 = vector.broadcast %cst_21 : f32 to vector<1x16xf32>
      %c0_22 = arith.constant 0 : index
      %c0_23 = arith.constant 0 : index
      %51 = vector.load %arg7[%c0_22, %c0_23] : memref<1x16xf32, #tpu.memory_space<vmem>>, vector<1x16xf32>
      tpu.vector_store %arg7[%c0_22, %c0_23], %50 {strides = array<i32>} : memref<1x16xf32, #tpu.memory_space<vmem>>, vector<1x16xf32>,
      %cst_24 = arith.constant 0.000000e+00 : f32
      %52 = vector.broadcast %cst_24 : f32 to vector<1x16xf32>
      %c0_25 = arith.constant 0 : index
      %c0_26 = arith.constant 0 : index
      %53 = vector.load %arg8[%c0_25, %c0_26] : memref<1x16xf32, #tpu.memory_space<vmem>>, vector<1x16xf32>
      tpu.vector_store %arg8[%c0_25, %c0_26], %52 {strides = array<i32>} : memref<1x16xf32, #tpu.memory_space<vmem>>, vector<1x16xf32>,
    } else {
    }
    %c0 = arith.constant 0 : index
    %c0_1 = arith.constant 0 : index
    %3 = vector.load %arg3[%c0, %c0_1] : memref<13x16xf32, #tpu.memory_space<vmem>>, vector<13x16xf32>
    %c0_2 = arith.constant 0 : index
    %c0_3 = arith.constant 0 : index
    %4 = vector.load %arg4[%c0_2, %c0_3] : memref<1x16xi32, #tpu.memory_space<vmem>>, vector<1x16xi32>
    %c1_i32 = arith.constant 1 : i32
    %5 = arith.muli %arg0, %c1_i32 : i32
    %6 = arith.addi %5, %arg1 : i32
    %7 = tpu.iota {dimensions = array<i32: 1>} : vector<1x16xi32>
    %c16_i32 = arith.constant 16 : i32
    %8 = arith.muli %6, %c16_i32 : i32
    %9 = vector.broadcast %8 : i32 to vector<1x16xi32>
    %10 = arith.addi %9, %7 : vector<1x16xi32>
    %c16_i32_4 = arith.constant 16 : i32
    %11 = vector.broadcast %c16_i32_4 : i32 to vector<1x16xi32>
    %12 = arith.cmpi slt, %10, %11 : vector<1x16xi32>
    %c-1_i32 = arith.constant -1 : i32
    %13 = vector.broadcast %c-1_i32 : i32 to vector<1x16xi32>
    %14 = arith.cmpi ne, %4, %13 : vector<1x16xi32>
    %15 = arith.andi %12, %14 : vector<1x16xi1>
    %16 = tpu.iota {dimensions = array<i32: 0>} : vector<13x16xi32>
    %17 = vector.broadcast %4 : vector<1x16xi32> to vector<13x16xi32>
    %18 = arith.cmpi eq, %16, %17 : vector<13x16xi32>
    %19 = arith.extui %18 : vector<13x16xi1> to vector<13x16xi32>
    %20 = arith.sitofp %19 : vector<13x16xi32> to vector<13x16xf32>
    %c0_5 = arith.constant 0 : index
    %c0_6 = arith.constant 0 : index
    %21 = vector.load %arg2[%c0_5, %c0_6] : memref<13x13xf32, #tpu.memory_space<vmem>>, vector<13x13xf32>
    %cst = arith.constant dense<0.000000e+00> : vector<13x16xf32>
    %22 = tpu.matmul %21, %20, %cst {dimension_numbers = #tpu.dot_dimension_numbers<[1], [0], [0], [1], [0, 0, 1, 1], [], []>} : vector<13x13xf32>, vector<13x16xf32>, vector<13x16xf32> -> vector<13x16xf32>
    %cst_7 = arith.constant dense<0xFF800000> : vector<16xf32>
    %23 = vector.multi_reduction <maximumf>, %3, %cst_7 [0] : vector<13x16xf32> to vector<16xf32>
    %24 = vector.shape_cast %23 : vector<16xf32> to vector<1x16xf32>
    %25 = vector.broadcast %24 : vector<1x16xf32> to vector<13x16xf32>
    %26 = arith.subf %3, %25 : vector<13x16xf32>
    %27 = math.exp %26 : vector<13x16xf32>
    %cst_8 = arith.constant dense<0.000000e+00> : vector<16xf32>
    %28 = vector.multi_reduction <add>, %27, %cst_8 [0] : vector<13x16xf32> to vector<16xf32>
    %29 = vector.shape_cast %28 : vector<16xf32> to vector<1x16xf32>
    %30 = math.log %29 : vector<1x16xf32>
    %31 = arith.addf %30, %24 : vector<1x16xf32>
    %32 = vector.broadcast %31 : vector<1x16xf32> to vector<13x16xf32>
    %33 = arith.subf %32, %3 : vector<13x16xf32>
    %34 = arith.mulf %22, %33 : vector<13x16xf32>
    %cst_9 = arith.constant dense<0.000000e+00> : vector<16xf32>
    %35 = vector.multi_reduction <add>, %34, %cst_9 [0] : vector<13x16xf32> to vector<16xf32>
    %36 = vector.shape_cast %35 : vector<16xf32> to vector<1x16xf32>
    %cst_10 = arith.constant 0.000000e+00 : f32
    %37 = vector.broadcast %cst_10 : f32 to vector<1x16xf32>
    %38 = arith.select %15, %36, %37 : vector<1x16xi1>, vector<1x16xf32>
    %c0_11 = arith.constant 0 : index
    %c0_12 = arith.constant 0 : index
    %39 = vector.load %arg7[%c0_11, %c0_12] : memref<1x16xf32, #tpu.memory_space<vmem>>, vector<1x16xf32>
    %40 = arith.addf %39, %38 : vector<1x16xf32>
    %c0_13 = arith.constant 0 : index
    %c0_14 = arith.constant 0 : index
    %41 = vector.load %arg7[%c0_13, %c0_14] : memref<1x16xf32, #tpu.memory_space<vmem>>, vector<1x16xf32>
    tpu.vector_store %arg7[%c0_13, %c0_14], %40 {strides = array<i32>} : memref<1x16xf32, #tpu.memory_space<vmem>>, vector<1x16xf32>,
    %c0_15 = arith.constant 0 : index
    %c0_16 = arith.constant 0 : index
    %42 = vector.load %arg8[%c0_15, %c0_16] : memref<1x16xf32, #tpu.memory_space<vmem>>, vector<1x16xf32>
    %43 = arith.extui %15 : vector<1x16xi1> to vector<1x16xi32>
    %44 = arith.sitofp %43 : vector<1x16xi32> to vector<1x16xf32>
    %45 = arith.addf %42, %44 : vector<1x16xf32>
    %c0_17 = arith.constant 0 : index
    %c0_18 = arith.constant 0 : index
    %46 = vector.load %arg8[%c0_17, %c0_18] : memref<1x16xf32, #tpu.memory_space<vmem>>, vector<1x16xf32>
    tpu.vector_store %arg8[%c0_17, %c0_18], %45 {strides = array<i32>} : memref<1x16xf32, #tpu.memory_space<vmem>>, vector<1x16xf32>,
    %c0_i32_19 = arith.constant 0 : i32
    %47 = arith.cmpi eq, %arg1, %c0_i32_19 : i32
    %48 = arith.extui %47 : i1 to i32
    %c0_i32_20 = arith.constant 0 : i32
    %49 = arith.cmpi ne, %48, %c0_i32_20 : i32
    scf.if %49 {
      %c0_21 = arith.constant 0 : index
      %c0_22 = arith.constant 0 : index
      %50 = vector.load %arg7[%c0_21, %c0_22] : memref<1x16xf32, #tpu.memory_space<vmem>>, vector<1x16xf32>
      %cst_23 = arith.constant dense<0.000000e+00> : vector<1xf32>
      %51 = vector.multi_reduction <add>, %50, %cst_23 [1] : vector<1x16xf32> to vector<1xf32>
      %52 = vector.shape_cast %51 : vector<1xf32> to vector<1x1xf32>
      %53 = vector.shape_cast %52 : vector<1x1xf32> to vector<1x1x1xf32>
      %c0_24 = arith.constant 0 : index
      %c0_25 = arith.constant 0 : index
      %c0_26 = arith.constant 0 : index
      %54 = vector.load %arg5[%c0_24, %c0_25, %c0_26] : memref<1x1x1xf32, #tpu.memory_space<vmem>>, vector<1x1x1xf32>
      tpu.vector_store %arg5[%c0_24, %c0_25, %c0_26], %53 {strides = array<i32>} : memref<1x1x1xf32, #tpu.memory_space<vmem>>, vector<1x1x1xf32>,
      %c0_27 = arith.constant 0 : index
      %c0_28 = arith.constant 0 : index
      %55 = vector.load %arg8[%c0_27, %c0_28] : memref<1x16xf32, #tpu.memory_space<vmem>>, vector<1x16xf32>
      %cst_29 = arith.constant dense<0.000000e+00> : vector<1xf32>
      %56 = vector.multi_reduction <add>, %55, %cst_29 [1] : vector<1x16xf32> to vector<1xf32>
      %57 = vector.shape_cast %56 : vector<1xf32> to vector<1x1xf32>
      %58 = vector.shape_cast %57 : vector<1x1xf32> to vector<1x1x1xf32>
      %c0_30 = arith.constant 0 : index
      %c0_31 = arith.constant 0 : index
      %c0_32 = arith.constant 0 : index
      %59 = vector.load %arg6[%c0_30, %c0_31, %c0_32] : memref<1x1x1xf32, #tpu.memory_space<vmem>>, vector<1x1x1xf32>
      tpu.vector_store %arg6[%c0_30, %c0_31, %c0_32], %58 {strides = array<i32>} : memref<1x1x1xf32, #tpu.memory_space<vmem>>, vector<1x1x1xf32>,
    } else {
    }
    return
  }
  func.func @transform_0(%arg0: i32, %arg1: i32) -> (i32, i32) {
    %c0_i32 = arith.constant 0 : i32
    %c0_i32_0 = arith.constant 0 : i32
    %c0_i32_1 = arith.constant 0 : i32
    return %c0_i32, %c0_i32_0 : i32, i32
  }
  func.func @transform_1(%arg0: i32, %arg1: i32) -> (i32, i32) {
    %c1_i32 = arith.constant 1 : i32
    %0 = arith.muli %arg0, %c1_i32 : i32
    %1 = arith.addi %0, %arg1 : i32
    %c0_i32 = arith.constant 0 : i32
    %2 = arith.minsi %1, %c0_i32 : i32
    %c0_i32_0 = arith.constant 0 : i32
    %c0_i32_1 = arith.constant 0 : i32
    return %c0_i32_0, %2 : i32, i32
  }
  func.func @transform_2(%arg0: i32, %arg1: i32) -> (i32, i32) {
    %c1_i32 = arith.constant 1 : i32
    %0 = arith.muli %arg0, %c1_i32 : i32
    %1 = arith.addi %0, %arg1 : i32
    %c0_i32 = arith.constant 0 : i32
    %2 = arith.minsi %1, %c0_i32 : i32
    %c0_i32_0 = arith.constant 0 : i32
    %c0_i32_1 = arith.constant 0 : i32
    return %c0_i32_0, %2 : i32, i32
  }
  func.func @transform_3(%arg0: i32, %arg1: i32) -> (i32, i32, i32) {
    %c0_i32 = arith.constant 0 : i32
    %c0_i32_0 = arith.constant 0 : i32
    %c0_i32_1 = arith.constant 0 : i32
    return %arg0, %c0_i32, %c0_i32_0 : i32, i32, i32
  }
  func.func @transform_4(%arg0: i32, %arg1: i32) -> (i32, i32, i32) {
    %c0_i32 = arith.constant 0 : i32
    %c0_i32_0 = arith.constant 0 : i32
    %c0_i32_1 = arith.constant 0 : i32
    return %arg0, %c0_i32, %c0_i32_0 : i32, i32, i32
  }
}

</mosaic_0001>

<bundles_post_ra>
// kernel: tpu_custom_call.1
= control target key start
LH: loop header
LB: loop body
LE: loop exit
PB: predicated region body
PF: predicated region fallthrough
CT: control target
= control target key end

     0   :  { %10 = vsyncpa [#allocation5], 0  ;;  %s491_s0 = inlined_call_operand.hbm [shape: f32[13,13], index: 0, kind: input, shape index: {}]   ;;  %s492_s1 = inlined_call_operand.hbm [shape: f32[13,16], index: 1, kind: input, shape index: {}]   ;;  %s493_s2 = inlined_call_operand.vmem [shape: s32[1,16], index: 2, kind: input, shape index: {}]   ;;  %s494_s3 = inlined_call_operand.hbm [shape: f32[1,1,1], index: 3, kind: output, shape index: {0}]   ;;  %s495_s4 = inlined_call_operand.hbm [shape: f32[1,1,1], index: 4, kind: output, shape index: {1}]  }
   0x1   :  { %11 = vsyncpa [#allocation8], 0 }
   0x2   :  { %12 = vsyncpa [#allocation6], 0 }
   0x3   :  { %13 = vsyncpa [#allocation11], 0  ;;  %s419_s15 = smov [#allocation4]  }
   0x4   :  { %s19_s16 = sshll.u32 %s419_s15, 4  ;;  %s20_s16 = int_to_ptr.vmem [resolvable:$true] %s19_s16 }
   0x5   :  { %s339_s17 = scalar_lea.vmem %s20_s16, 256  ;;  %p344_p1 = scmp.lt.s32.totalorder %s20_s16, %s20_s16 }
   0x6   :  { %p340_p0 = scmp.ne.s32.totalorder %s20_s16, %s339_s17  ;;  %p345_p2 = scmp.lt.s32.totalorder %s339_s17, %s339_s17 }
   0x8   :  { %p346_p3 = por %p345_p2, %p344_p1 }
   0xa   :  { %p347_p4 = pnand %p346_p3, %p340_p0 }
   0xc   :  { %350 = shalt.err (!%p347_p4)
}
   0xd   :  { %s420_s18 = smov 128   ;;  %s421_s19 = smov 8  }
   0xe   :  { %25 = dma.hbm_to_vmem [thread:$0]  %s491_s0, 256, %s20_s16, [#allocation5], %s420_s18, %s420_s18, %s421_s19  }
   0xf   :  { %s422_s22 = smov [#allocation7]  }
  0x10   :  { %s36_s23 = sshll.u32 %s422_s22, 4  ;;  %s37_s23 = int_to_ptr.vmem [resolvable:$true] %s36_s23 }
  0x11   :  { %s359_s24 = scalar_lea.vmem %s37_s23, 256  ;;  %p364_p6 = scmp.lt.s32.totalorder %s37_s23, %s37_s23 }
  0x12   :  { %p360_p5 = scmp.ne.s32.totalorder %s37_s23, %s359_s24  ;;  %p365_p7 = scmp.lt.s32.totalorder %s359_s24, %s359_s24 }
  0x14   :  { %p366_p8 = por %p365_p7, %p364_p6 }
  0x16   :  { %p367_p9 = pnand %p366_p8, %p360_p5 }
  0x18   :  { %370 = shalt.err (!%p367_p9)
}
  0x19   :  { %42 = dma.hbm_to_vmem [thread:$0]  %s492_s1, 256, %s37_s23, [#allocation8], %s420_s18, %s420_s18, %s421_s19  }
  0x1a   :  { %411 = dma.done.wait [#allocation5], 256  }
  0x1b   :  { %412 = vsyncadd [#allocation5], 4294967040 }
  0x1c   :  { %413 = dma.done.wait [#allocation8], 256  }
  0x1d   :  { %414 = vsyncadd [#allocation8], 4294967040  ;;  %vm82_vm0 = vcmask 122880   ;;  %v89_v0 = vlaneseq  ;;  %v423_v1 = vmov 0.0   ;;  %vm112_vm1 = vcmask 105472   ;;  %v110_v7 = vld [vmem:[#allocation4] sm:$0xff] }
  0x1e   :  { %83 = vst.msk [vmem:[#allocation2] sm:$0x1] %vm82_vm0, %v423_v1  ;;  %84 = vst.msk [vmem:[#allocation3] sm:$0x1] %vm82_vm0, %v423_v1  ;;  %v87_v6 = vld [vmem:[%s493_s2] sm:$0x1]  ;;  %314 = vmatprep.mubr.msk.f32.mxu0 %vm112_vm1, %v110_v7 }
  0x1f   :  { %v90_v2 = vand.u32 127, %v89_v0  ;;  %v98_v3 = vshrl.u32 %v89_v0, 7  ;;  %vm95_vm3 = vcmp.ne.s32.totalorder %v87_v6, 4294967295  ;;  %vm119_vm5 = vcmask 1044480   ;;  %v111_v14 = vld [vmem:[#allocation4 + $0x8] sm:$0x1f] }
  0x20   :  { %v424_v15 = vmov 1.0   ;;  %v85_v16 = vld [vmem:[#allocation7] sm:$0xff]  ;;  %v86_v17 = vld [vmem:[#allocation7 + $0x8] sm:$0x1f]  ;;  %vm198_vm8 = vcmask 130048   ;;  %vm200_vm9 = vcmask 126976  }
  0x21   :  { %v102_v4 = vsub.s32 0, %v98_v3  ;;  %vm94_vm2 = vcmp.lt.s32.totalorder %v90_v2, 16  ;;  %v99_v5 = vadd.s32 8, %v98_v3  ;;  %v199_v18 = vsel %vm198_vm8, %v85_v16, -inf  ;;  %s425_s1 = smov [#allocation9]   ;;  %s426_s28 = smov [#allocation10]  }
  0x22   :  { %vm464_vm4 = vmand %vm94_vm2, %vm95_vm3  ;;  %v201_v19 = vsel %vm200_vm9, %v86_v17, -inf  ;;  %s270_s2 = sshll.u32 %s425_s1, 4  ;;  %vm257_vm10 = vcmask 0   ;;  %s280_s29 = sshll.u32 %s426_s28, 4  ;;  %s271_s2 = int_to_ptr.vmem [resolvable:$true] %s270_s2  ;;  %s281_s29 = int_to_ptr.vmem [resolvable:$true] %s280_s29 }
  0x23   :  { %v103_v8 = vrot.slane %v87_v6, %v102_v4  ;;  %v305_v11 = vsel %vm464_vm4, 1.0, %v423_v1  ;;  %v202_v20 = vmax.f32 %v199_v18, %v201_v19  ;;  %s371_s30 = scalar_lea.vmem %s271_s2, 16  ;;  %s375_s5 = scalar_lea.vmem %s271_s2, 32 }
  0x24   :  { %p372_p10 = scmp.ne.s32.totalorder %s271_s2, %s371_s30  ;;  %p376_p11 = scmp.lt.s32.totalorder %s271_s2, %s271_s2 }
  0x25   :  { %v245_v9 = vld [vmem:[#allocation3] sm:$0x1]  ;;  %vm105_vm6 = vcmp.eq.s32.totalorder %v99_v5, %v103_v8  ;;  %vm104_vm7 = vcmp.eq.s32.totalorder %v98_v3, %v103_v8  ;;  %v203_v21 = vrot.slane %v202_v20, 4  ;;  %v241_v60 = vld [vmem:[#allocation2] sm:$0x1]  ;;  %p377_p12 = scmp.lt.s32.totalorder %s375_s5, %s371_s30 }
  0x26   :  { %v300_v12 = vsel %vm105_vm6, 1.0, %v423_v1  ;;  %v248_v13 = vadd.f32 %v305_v11, %v245_v9 }
  0x27   :  { %310 = vmatprep.subr.msk.mxu0 %vm119_vm5, %v300_v12  ;;  %v204_v22 = vmax.f32 %v202_v20, %v203_v21  ;;  %p378_p13 = por %p377_p12, %p376_p11 }
  0x28   :  { %249 = vst.msk [vmem:[#allocation3] sm:$0x1] %vm82_vm0, %v248_v13  ;;  %311 = vmatpush3.msk.msra.mxu0 %vm119_vm5, %v300_v12 }
  0x29   :  { %312 = vmatprep.subr.msk.mxu0 %vm104_vm7, %v424_v15  ;;  %v205_v23 = vrot.slane %v204_v22, 2  ;;  %p379_p0 = pnand %p378_p13, %p372_p10 }
  0x2a   :  { %313 = vmatpush3.msk.msra.mxu0 %vm104_vm7, %v424_v15 }
  0x2b   :  { %315 = vmatmul.mubr.msk.f32.vlgmr.msra.gmra.mxu0 %vm112_vm1, %v111_v14  ;;  %v206_v24 = vmax.f32 %v204_v22, %v205_v23 }
  0x2d   :  { %v207_v25 = vrot.slane %v206_v24, 1 }
  0x2f   :  { %v208_v26 = vmax.f32 %v206_v24, %v207_v25  ;;  %v259_v0 = vld [vmem:[#allocation3] sm:$0x1] }
  0x30   :  { %v260_v2 = vsel %vm82_vm0, %v259_v0, 0.0 }
  0x31   :  { %v209_v27 = vsub.f32 %v85_v16, %v208_v26  ;;  %v210_v28 = vsub.f32 %v86_v17, %v208_v26 }
  0x33   :  { %v211_v29 = vmul.f32 1.442695, %v209_v27  ;;  %v213_v30 = vmul.f32 1.442695, %v210_v28 }
  0x35   :  { %325 = vpow2.f32 %v211_v29 }
  0x36   :  { %327 = vpow2.f32 %v213_v30 }
  0x42   :  { %v326_v31 = vpop.eup %325 }
  0x43   :  { %v328_v32 = vpop.eup %327  ;;  %v215_v33 = vsel %vm198_vm8, %v326_v31, 0.0 }
  0x44   :  { %v216_v34 = vsel %vm200_vm9, %v328_v32, 0.0 }
  0x45   :  { %v217_v35 = vadd.f32 %v216_v34, %v215_v33 }
  0x47   :  { %v218_v36 = vrot.slane %v217_v35, 4 }
  0x49   :  { %v219_v37 = vadd.f32 %v218_v36, %v217_v35 }
  0x4b   :  { %v220_v38 = vrot.slane %v219_v37, 2 }
  0x4d   :  { %v221_v39 = vadd.f32 %v220_v38, %v219_v37 }
  0x4f   :  { %v222_v40 = vrot.slane %v221_v39, 1 }
  0x51   :  { %v223_v41 = vadd.f32 %v222_v40, %v221_v39 }
  0x53   :  { %329 = vlog2.f32 %v223_v41 }
  0x60   :  { %v330_v42 = vpop.eup %329 }
  0x61   :  { %v225_v43 = vmul.f32 0.6931472, %v330_v42 }
  0x63   :  { %v226_v44 = vadd.f32 %v225_v43, %v208_v26 }
  0x65   :  { %v228_v45 = vsub.f32 %v226_v44, %v86_v17  ;;  %v227_v46 = vsub.f32 %v226_v44, %v85_v16 }
  0xeb   :  { %v316_v47 = vpop.f32.mrf.mxu0 }
  0xec   :  { %v230_v48 = vmul.f32 %v316_v47, %v228_v45 }
  0xed   :  { %v189_v49 = vpop.f32.mrf.mxu0 }
  0xee   :  { %v229_v50 = vmul.f32 %v227_v46, %v189_v49  ;;  %v232_v51 = vsel %vm200_vm9, %v230_v48, 0.0 }
  0xf0   :  { %v231_v52 = vsel %vm198_vm8, %v229_v50, 0.0 }
  0xf1   :  { %v233_v53 = vadd.f32 %v232_v51, %v231_v52 }
  0xf3   :  { %v234_v54 = vrot.slane %v233_v53, 4 }
  0xf5   :  { %v235_v55 = vadd.f32 %v234_v54, %v233_v53 }
  0xf7   :  { %v236_v56 = vrot.slane %v235_v55, 2 }
  0xf9   :  { %v237_v57 = vadd.f32 %v236_v56, %v235_v55 }
  0xfb   :  { %v238_v58 = vrot.slane %v237_v57, 1 }
  0xfd   :  { %v239_v59 = vadd.f32 %v238_v58, %v237_v57 }
  0xff   :  { %v240_v61 = vsel %vm464_vm4, %v239_v59, 0.0 }
 0x100   :  { %v242_v62 = vadd.f32 %v241_v60, %v240_v61 }
 0x102   :  { %244 = vst.msk [vmem:[#allocation2] sm:$0x1] %vm82_vm0, %v242_v62 }
 0x109   :  { %v253_v63 = vld [vmem:[#allocation2] sm:$0x1] }
 0x10a   :  { %v254_v1 = vsel %vm82_vm0, %v253_v63, 0.0 }
 0x10b   :  { %255 = vadd.xlane.f32.xlu0 %v254_v1 }
 0x10f   :  { %261 = vadd.xlane.f32.xlu0 %v260_v2 }
 0x194   :  { %v256_v3 = vpop.xlane.xlu0 %255 }
 0x195   :  { %258 = vst.msk [vmem:[#allocation9] sm:$0x1] %vm257_vm10, %v256_v3 }
 0x196   :  { %382 = shalt.err (!%p379_p0)
}
 0x197   :  { %273 = dma.vmem_to_hbm [thread:$0]  %s271_s2, 16, %s494_s3, [#allocation6]  }
 0x198   :  { %v262_v4 = vpop.xlane.xlu0 %261  ;;  %s391_s8 = scalar_lea.vmem %s281_s29, 16  ;;  %s395_s9 = scalar_lea.vmem %s281_s29, 32 }
 0x199   :  { %263 = vst.msk [vmem:[#allocation10] sm:$0x1] %vm257_vm10, %v262_v4  ;;  %p392_p1 = scmp.ne.s32.totalorder %s281_s29, %s391_s8  ;;  %p396_p2 = scmp.lt.s32.totalorder %s281_s29, %s281_s29 }
 0x19a   :  { %p397_p3 = scmp.lt.s32.totalorder %s395_s9, %s391_s8 }
 0x19c   :  { %p398_p4 = por %p397_p3, %p396_p2 }
 0x19e   :  { %p399_p5 = pnand %p398_p4, %p392_p1 }
 0x1a0   :  { %402 = shalt.err (!%p399_p5)
}
 0x1a1   :  { %283 = dma.vmem_to_hbm [thread:$0]  %s281_s29, 16, %s495_s4, [#allocation11]  }
 0x1a2   :  { %415 = dma.done.wait [#allocation6], 16  }
 0x1a3   :  { %416 = vsyncadd [#allocation6], 4294967280 }
 0x1a4   :  { %417 = dma.done.wait [#allocation11], 16  }
 0x1a5   :  { %418 = vsyncadd [#allocation11], 4294967280 }
 0x1a6   :  { %290 = vsyncpa [#allocation5], 1 }
 0x1a7   :  { %291 = vsyncpa [#allocation8], 1 }
 0x1a8   :  { %292 = vsyncpa [#allocation6], 1 }
 0x1a9   :  { %293 = vsyncpa [#allocation11], 1 }

</bundles_post_ra>
